<compile_context>
chip_gen: v7x
topology: tpu7x:2x2x1
jax: 0.10.0
libtpu: 0.0.40
codegen_flags: <defaults>
</compile_context>

<pallas_src>
import jax
import jax.numpy as jnp
from jax.experimental import pallas as pl
from jax.experimental.pallas import tpu as pltpu

IMAGE_DIM = 28 * 28  # 784
NUM_CLASSES = 10
MAX_TILE_ROWS = 2048  # f32 x tile = 2048*784*4 B ~= 6.1 MiB; 2x buffered ~= 12.3 MiB


def _round_up(n, m):
    return ((n + m - 1) // m) * m


def _logreg_kernel(x_ref, w_ref, b_ref, o_ref):
    # x_ref: (TB, 784) f32/bf16   w_ref: (784, 10) bf16   b_ref: (1, 10) f32   o_ref: (TB, 10) f32
    x = x_ref[...].astype(jnp.bfloat16)   # in-kernel cast: hidden under the x DMA
    w = w_ref[...]
    b = b_ref[...]

    # Linear layer on the MXU: bf16 x bf16 -> f32 accumulate.
    logits = jnp.dot(x, w, preferred_element_type=jnp.float32) + b  # (TB, 10) f32

    # Numerically-stable softmax along dim=1 (last axis).  Exact division (no approx recip):
    # rows sum to 1 within f32 rounding and match the host reference.
    m = jnp.max(logits, axis=-1, keepdims=True)
    e = jnp.exp(logits - m)
    denom = jnp.sum(e, axis=-1, keepdims=True)
    o_ref[...] = (e / denom).astype(o_ref.dtype)


def logistic_regression_forward(x_nchw, weight_t, bias):
    """Forward pass of LogisticRegressionModel.

    x_nchw:   (B, C, H, W) with C*H*W == 784 (f32 or bf16)
    weight_t: (784, 10)  -- transpose of PyTorch nn.Linear(784, 10).weight
    bias:     (10,)
    returns:  (B, 10) float32 softmax probabilities
    """
    B = x_nchw.shape[0]

    # Flatten (x.view(x.size(0), -1)); no dtype cast, no pad -> no extra HBM passes over x.
    x2d = x_nchw.reshape(B, -1)                                 # (B, 784)
    if x2d.dtype not in (jnp.bfloat16, jnp.float32):
        x2d = x2d.astype(jnp.float32)
    w_bf16 = weight_t.astype(jnp.bfloat16)                      # (784, 10), tiny
    b2d = bias.reshape(1, NUM_CLASSES).astype(jnp.float32)      # (1, 10)

    # Batch tile: multiple of 16 (bf16 sublane pack), aim for >= ~8 grid steps for large B
    # (megacore + DMA/compute overlap), capped so the double-buffered tile stays in VMEM.
    tb = max(16, min(MAX_TILE_ROWS, _round_up(pl.cdiv(B, 8), 16)))
    num_tiles = pl.cdiv(B, tb)   # Pallas masks the partial last block

    x_bytes = 2 if x2d.dtype == jnp.bfloat16 else 4
    cost = pl.CostEstimate(
        flops=2 * B * IMAGE_DIM * NUM_CLASSES,
        transcendentals=B * NUM_CLASSES,
        bytes_accessed=(B * IMAGE_DIM * x_bytes               # x (native dtype)
                        + IMAGE_DIM * NUM_CLASSES * 2         # W (bf16)
                        + B * NUM_CLASSES * 4),               # out (f32)
    )

    out = pl.pallas_call(
        _logreg_kernel,
        out_shape=jax.ShapeDtypeStruct((B, NUM_CLASSES), jnp.float32),
        grid=(num_tiles,),
        in_specs=[
            pl.BlockSpec((tb, IMAGE_DIM), lambda i: (i, 0)),            # x: tiled over batch
            pl.BlockSpec((IMAGE_DIM, NUM_CLASSES), lambda i: (0, 0)),   # W: resident
            pl.BlockSpec((1, NUM_CLASSES), lambda i: (0, 0)),           # b: resident
        ],
        out_specs=pl.BlockSpec((tb, NUM_CLASSES), lambda i: (i, 0)),
        compiler_params=pltpu.CompilerParams(
            dimension_semantics=("parallel",),
            vmem_limit_bytes=32 * 1024 * 1024,   # headroom for the f32 x tile on v5e's 16 MiB default
        ),
        cost_estimate=cost,
    )(x2d, w_bf16, b2d)

    return out


if __name__ == "__main__":
    key = jax.random.PRNGKey(0)
    kx, kw, kb = jax.random.split(key, 3)

    # Deterministic parameter init (shapes from nn.Linear(784, 10)).
    bound = 1.0 / (IMAGE_DIM ** 0.5)
    weight = jax.random.uniform(kw, (NUM_CLASSES, IMAGE_DIM),
                                minval=-bound, maxval=bound, dtype=jnp.float32)
    bias = jax.random.uniform(kb, (NUM_CLASSES,),
                              minval=-bound, maxval=bound, dtype=jnp.float32)
    weight_t = weight.T  # (784, 10)

    # Small MNIST-like batch: (B=2, C=1, H=28, W=28) NCHW.
    x = jax.random.normal(kx, (2, 1, 28, 28), dtype=jnp.float32)

    out = logistic_regression_forward(x, weight_t, bias)
    out = jax.block_until_ready(out)

    # Reference with the same bf16-quantized operands (kernel accumulates in f32 on the MXU).
    x_bf = x.reshape(2, -1).astype(jnp.bfloat16).astype(jnp.float32)
    w_bf = weight_t.astype(jnp.bfloat16).astype(jnp.float32)
    ref_bf = jax.nn.softmax(x_bf @ w_bf + bias, axis=1)
    # Full-precision reference (PyTorch f32 semantics) with a looser tolerance.
    ref_f32 = jax.nn.softmax(x.reshape(2, -1) @ weight_t + bias, axis=1)

    assert out.shape == (2, NUM_CLASSES)
    assert bool(jnp.all(jnp.isfinite(out)))
    assert jnp.allclose(out, ref_bf, atol=1e-3), "mismatch vs bf16-quantized reference"
    assert jnp.allclose(out, ref_f32, atol=2e-2), "mismatch vs f32 reference"
    assert jnp.allclose(jnp.sum(out, axis=1), 1.0, atol=1e-4)

    print("KERNEL_OK")
</pallas_src>

<mosaic_0001>
module attributes {stable_mosaic.version = 11 : i64} {
  func.func @_logreg_kernel(%arg0: i32, %arg1: memref<16x784xf32, #tpu.memory_space<vmem>>, %arg2: memref<784x10xbf16, #tpu.memory_space<vmem>>, %arg3: memref<1x10xf32, #tpu.memory_space<vmem>>, %arg4: memref<16x10xf32, #tpu.memory_space<vmem>>) attributes {dimension_semantics = [#tpu.dimension_semantics<parallel>], iteration_bounds = array<i64: 1>, scalar_prefetch = 0 : i64, scratch_operands = 0 : i64, tpu.core_type = #tpu.core_type<tc>, window_params = [{transform_indices = @transform_0, window_bounds = array<i64: 16, 784>}, {pipeline_mode = #tpu.pipeline_mode<synchronous>, transform_indices = @transform_1, window_bounds = array<i64: 784, 10>}, {pipeline_mode = #tpu.pipeline_mode<synchronous>, transform_indices = @transform_2, window_bounds = array<i64: 1, 10>}, {transform_indices = @transform_3, window_bounds = array<i64: 16, 10>}]} {
    %c0 = arith.constant 0 : index
    %c0_0 = arith.constant 0 : index
    %0 = vector.load %arg1[%c0, %c0_0] : memref<16x784xf32, #tpu.memory_space<vmem>>, vector<16x784xf32>
    %1 = arith.truncf %0 : vector<16x784xf32> to vector<16x784xbf16>
    %c0_1 = arith.constant 0 : index
    %c0_2 = arith.constant 0 : index
    %2 = vector.load %arg2[%c0_1, %c0_2] : memref<784x10xbf16, #tpu.memory_space<vmem>>, vector<784x10xbf16>
    %c0_3 = arith.constant 0 : index
    %c0_4 = arith.constant 0 : index
    %3 = vector.load %arg3[%c0_3, %c0_4] : memref<1x10xf32, #tpu.memory_space<vmem>>, vector<1x10xf32>
    %cst = arith.constant dense<0.000000e+00> : vector<16x10xf32>
    %4 = tpu.matmul %1, %2, %cst {dimension_numbers = #tpu.dot_dimension_numbers<[1], [0], [0], [1], [0, 0, 1, 1], [], []>} : vector<16x784xbf16>, vector<784x10xbf16>, vector<16x10xf32> -> vector<16x10xf32>
    %5 = vector.broadcast %3 : vector<1x10xf32> to vector<16x10xf32>
    %6 = arith.addf %4, %5 : vector<16x10xf32>
    %cst_5 = arith.constant dense<0xFF800000> : vector<16xf32>
    %7 = vector.multi_reduction <maximumf>, %6, %cst_5 [1] : vector<16x10xf32> to vector<16xf32>
    %8 = vector.shape_cast %7 : vector<16xf32> to vector<16x1xf32>
    %9 = vector.broadcast %8 : vector<16x1xf32> to vector<16x10xf32>
    %10 = arith.subf %6, %9 : vector<16x10xf32>
    %11 = math.exp %10 : vector<16x10xf32>
    %cst_6 = arith.constant dense<0.000000e+00> : vector<16xf32>
    %12 = vector.multi_reduction <add>, %11, %cst_6 [1] : vector<16x10xf32> to vector<16xf32>
    %13 = vector.shape_cast %12 : vector<16xf32> to vector<16x1xf32>
    %14 = vector.broadcast %13 : vector<16x1xf32> to vector<16x10xf32>
    %15 = arith.divf %11, %14 : vector<16x10xf32>
    %c0_7 = arith.constant 0 : index
    %c0_8 = arith.constant 0 : index
    %16 = vector.load %arg4[%c0_7, %c0_8] : memref<16x10xf32, #tpu.memory_space<vmem>>, vector<16x10xf32>
    tpu.vector_store %arg4[%c0_7, %c0_8], %15 {strides = array<i32>} : memref<16x10xf32, #tpu.memory_space<vmem>>, vector<16x10xf32>,
    return
  }
  func.func @transform_0(%arg0: i32) -> (i32, i32) {
    %c0_i32 = arith.constant 0 : i32
    %c0_i32_0 = arith.constant 0 : i32
    return %arg0, %c0_i32 : i32, i32
  }
  func.func @transform_1(%arg0: i32) -> (i32, i32) {
    %c0_i32 = arith.constant 0 : i32
    %c0_i32_0 = arith.constant 0 : i32
    %c0_i32_1 = arith.constant 0 : i32
    return %c0_i32, %c0_i32_0 : i32, i32
  }
  func.func @transform_2(%arg0: i32) -> (i32, i32) {
    %c0_i32 = arith.constant 0 : i32
    %c0_i32_0 = arith.constant 0 : i32
    %c0_i32_1 = arith.constant 0 : i32
    return %c0_i32, %c0_i32_0 : i32, i32
  }
  func.func @transform_3(%arg0: i32) -> (i32, i32) {
    %c0_i32 = arith.constant 0 : i32
    %c0_i32_0 = arith.constant 0 : i32
    return %arg0, %c0_i32 : i32, i32
  }
}

</mosaic_0001>

<bundles_post_ra>
// kernel: tpu_custom_call.1
= control target key start
LH: loop header
LB: loop body
LE: loop exit
PB: predicated region body
PF: predicated region fallthrough
CT: control target
= control target key end

     0   :  { %8 = vsyncpa [#allocation3], 0  ;;  %v55_v28 = vlaneseq  ;;  %v1055_v32 = vmov 1983009808   ;;  %v1056_v53 = vmov 0.0   ;;  %vm1057_vm0 = vmmov 0   ;;  %s1315_s0 = inlined_call_operand.vmem [shape: f32[2,784], index: 0, kind: input, shape index: {}]   ;;  %s1316_s1 = inlined_call_operand.vmem [shape: bf16[784,10], index: 1, kind: input, shape index: {}]   ;;  %s1317_s2 = inlined_call_operand.vmem [shape: f32[1,10], index: 2, kind: input, shape index: {}]   ;;  %s1318_s3 = inlined_call_operand.hbm [shape: f32[2,10], index: 3, kind: output, shape index: {}]  }
   0x1   :  { %v950_v0 = vld [vmem:[%s1316_s1 + $0x40] sm:$0xff]   ;;  %v954_v4 = vld [vmem:[%s1316_s1 + $0x48] sm:$0xff]   ;;  %v958_v8 = vld [vmem:[%s1316_s1 + $0x50] sm:$0xff]   ;;  %v53_v33 = vunpack.c.l.s4 %v1055_v32  ;;  %vm610_vm1 = vcmask 130048   ;;  %vm778_vm2 = vcmask 80896  }
   0x2   :  { %v951_v1 = vld [vmem:[%s1316_s1] sm:$0xff]   ;;  %870 = vmatprep.subr.bf16.mxu0 %v950_v0  ;;  %v955_v5 = vld [vmem:[%s1316_s1 + $0x8] sm:$0xff]   ;;  %v959_v9 = vld [vmem:[%s1316_s1 + $0x10] sm:$0xff]   ;;  %v56_v34 = vshrl.u32 %v55_v28, 7 }
   0x3   :  { %v952_v2 = vld [vmem:[%s1316_s1 + $0xc0] sm:$0xff]   ;;  %871 = vmatpush3.bf16.msra.mxu0 %v951_v1  ;;  %v956_v6 = vld [vmem:[%s1316_s1 + $0xc8] sm:$0xff]   ;;  %v960_v10 = vld [vmem:[%s1316_s1 + $0xd0] sm:$0xff]   ;;  %v54_v37 = vunpack.c.0.s8 %v53_v33 }
   0x4   :  { %v953_v3 = vld [vmem:[%s1316_s1 + $0x80] sm:$0xff]   ;;  %892 = vmatprep.subr.bf16.mxu1 %v952_v2  ;;  %872 = vmatprep.subr.bf16.mxu0 %v954_v4  ;;  %v957_v7 = vld [vmem:[%s1316_s1 + $0x88] sm:$0xff]   ;;  %v961_v11 = vld [vmem:[%s1316_s1 + $0x90] sm:$0xff]  }
   0x5   :  { %893 = vmatpush3.bf16.msra.mxu1 %v953_v3  ;;  %v962_v12 = vld [vmem:[%s1316_s1 + $0x58] sm:$0xff]   ;;  %v966_v16 = vld [vmem:[%s1316_s1 + $0x60] sm:$0xff]   ;;  %v970_v20 = vld [vmem:[%s1316_s1 + $0x68] sm:$0xff]   ;;  %v1186_v40 = vsub.s32 %v54_v37, %v56_v34 }
   0x6   :  { %894 = vmatprep.subr.bf16.mxu1 %v956_v6  ;;  %v963_v13 = vld [vmem:[%s1316_s1 + $0x18] sm:$0xff]   ;;  %v967_v17 = vld [vmem:[%s1316_s1 + $0x20] sm:$0xff]   ;;  %v971_v21 = vld [vmem:[%s1316_s1 + $0x28] sm:$0xff]  }
   0x7   :  { %873 = vmatpush3.bf16.msra.mxu0 %v955_v5  ;;  %v964_v14 = vld [vmem:[%s1316_s1 + $0xd8] sm:$0xff]   ;;  %v968_v18 = vld [vmem:[%s1316_s1 + $0xe0] sm:$0xff]   ;;  %v972_v22 = vld [vmem:[%s1316_s1 + $0xe8] sm:$0xff]  }
   0x8   :  { %874 = vmatprep.subr.bf16.mxu0 %v958_v8  ;;  %v965_v15 = vld [vmem:[%s1316_s1 + $0x98] sm:$0xff]   ;;  %v969_v19 = vld [vmem:[%s1316_s1 + $0xa0] sm:$0xff]   ;;  %v973_v23 = vld [vmem:[%s1316_s1 + $0xa8] sm:$0xff]  }
   0x9   :  { %895 = vmatpush3.bf16.msra.mxu1 %v957_v7  ;;  %v974_v24 = vld [vmem:[%s1316_s1 + $0x70] sm:$0xff]   ;;  %v978_v29 = vld [vmem:[%s1316_s1 + $0x78] sm:$0xff]   ;;  %v990_v42 = vld [vmem:[%s1316_s1 + $0x140] sm:$0xff]  }
   0xa   :  { %896 = vmatprep.subr.bf16.mxu1 %v960_v10  ;;  %v975_v25 = vld [vmem:[%s1316_s1 + $0x30] sm:$0xff]   ;;  %v979_v30 = vld [vmem:[%s1316_s1 + $0x38] sm:$0xff]   ;;  %v995_v0 = vld [vmem:[%s1316_s1 + $0x100] sm:$0xff]  }
   0xb   :  { %875 = vmatpush3.bf16.msra.mxu0 %v959_v9  ;;  %v976_v26 = vld [vmem:[%s1316_s1 + $0xf0] sm:$0xff]   ;;  %v980_v31 = vld [vmem:[%s1316_s1 + $0xf8] sm:$0xff]   ;;  %v996_v3 = vld [vmem:[%s1316_s1 + $0x148] sm:$0xff]  }
   0xc   :  { %876 = vmatprep.subr.bf16.mxu0 %v962_v12  ;;  %v977_v27 = vld [vmem:[%s1316_s1 + $0xb0] sm:$0xff]   ;;  %v983_v36 = vld [vmem:[%s1315_s0 + $0x1c] ss:$14 sps:$4 sm:$0xff]   ;;  %v985_v38 = vld [vmem:[%s1315_s0 + $0x38] ss:$14 sps:$4 sm:$0xff]  }
   0xd   :  { %897 = vmatpush3.bf16.msra.mxu1 %v961_v11  ;;  %v981_v35 = vld [vmem:[%s1315_s0] ss:$14 sps:$4 sm:$0xff]   ;;  %v989_v41 = vld [vmem:[%s1316_s1 + $0xb8] sm:$0xff]   ;;  %v991_v43 = vld [vmem:[%s1315_s0 + $0x4] ss:$14 sps:$4 sm:$0xff]   ;;  %v72_v46 = vrot.slane %v983_v36, %v1186_v40  ;;  %v129_v47 = vrot.slane %v985_v38, %v1186_v40 }
   0xe   :  { %898 = vmatprep.subr.bf16.mxu1 %v964_v14  ;;  %v987_v39 = vld [vmem:[%s1315_s0 + $0x54] ss:$14 sps:$4 sm:$0xff]   ;;  %v58_v45 = vrot.slane %v981_v35, %v1186_v40  ;;  %v993_v49 = vld [vmem:[%s1315_s0 + $0x3c] ss:$14 sps:$4 sm:$0xff]   ;;  %v994_v50 = vld [vmem:[%s1315_s0 + $0x58] ss:$14 sps:$4 sm:$0xff]   ;;  %v65_v51 = vrot.slane %v991_v43, %v1186_v40 }
   0xf   :  { %877 = vmatpush3.bf16.msra.mxu0 %v963_v13  ;;  %v992_v44 = vld [vmem:[%s1315_s0 + $0x20] ss:$14 sps:$4 sm:$0xff]   ;;  %v143_v48 = vrot.slane %v987_v39, %v1186_v40  ;;  %v136_v59 = vrot.slane %v993_v49, %v1186_v40  ;;  %v150_v60 = vrot.slane %v994_v50, %v1186_v40  ;;  %v1000_v9 = vld [vmem:[%s1316_s1 + $0x158] sm:$0xff]  }
  0x10   :  { %878 = vmatprep.subr.bf16.mxu0 %v966_v16  ;;  %v79_v52 = vrot.slane %v992_v44, %v1186_v40  ;;  %v81_v54 = vcombine.high %v58_v45, %v72_v46  ;;  %v80_v56 = vcombine.low %v58_v45, %v72_v46  ;;  %v997_v6 = vld [vmem:[%s1316_s1 + $0x108] sm:$0xff]   ;;  %v998_v7 = vld [vmem:[%s1316_s1 + $0x150] sm:$0xff]   ;;  %v1001_v10 = vld [vmem:[%s1316_s1 + $0x118] sm:$0xff]  }
  0x11   :  { %899 = vmatpush3.bf16.msra.mxu1 %v965_v15  ;;  %v152_v55 = vcombine.high %v129_v47, %v143_v48  ;;  %v151_v57 = vcombine.low %v129_v47, %v143_v48  ;;  %v154_v1 = vcombine.high %v136_v59, %v150_v60  ;;  %v153_v2 = vcombine.low %v136_v59, %v150_v60  ;;  %v999_v8 = vld [vmem:[%s1316_s1 + $0x110] sm:$0xff]   ;;  %v1002_v11 = vld [vmem:[%s1316_s1 + $0x160] sm:$0xff]   ;;  %v1013_v16 = vld [vmem:[%s1315_s0 + $0xc] ss:$14 sps:$4 sm:$0x33]  }
  0x12   :  { %900 = vmatprep.subr.bf16.mxu1 %v968_v18  ;;  %v83_v58 = vcombine.high %v65_v51, %v79_v52  ;;  %v82_v61 = vcombine.low %v65_v51, %v79_v52  ;;  %v1010_v12 = vld [vmem:[%s1316_s1 + $0x180] sm:$0xff]   ;;  %v1011_v14 = vld [vmem:[%s1315_s0 + $0x8] ss:$14 sps:$4 sm:$0xff]  }
  0x13   :  { %879 = vmatpush3.bf16.msra.mxu0 %v967_v17  ;;  %v205_v62 = vpack.c.bf16 %v152_v55, %v81_v54  ;;  %v204_v63 = vpack.c.bf16 %v151_v57, %v80_v56  ;;  %v1003_v13 = vld [vmem:[%s1316_s1 + $0x120] sm:$0xff]   ;;  %v1016_v17 = vld [vmem:[%s1315_s0 + $0x28] ss:$14 sps:$4 sm:$0x33]   ;;  %v1009_v43 = vld [vmem:[%s1316_s1 + $0x138] sm:$0xff]  }
  0x14   :  { %880 = vmatprep.subr.bf16.mxu0 %v970_v20  ;;  %v207_v4 = vpack.c.bf16 %v154_v1, %v83_v58  ;;  %v206_v5 = vpack.c.bf16 %v153_v2, %v82_v61  ;;  %v1014_v15 = vld [vmem:[%s1315_s0 + $0x24] ss:$14 sps:$4 sm:$0xff]   ;;  %v1004_v18 = vld [vmem:[%s1316_s1 + $0x168] sm:$0xff]   ;;  %v819_v46 = vld [vmem:[%s1317_s2] ss:$0 sm:$0xff] }
  0x15   :  { %901 = vmatpush3.bf16.msra.mxu1 %v969_v19  ;;  %646 = vmatprep.mubr.bf16.mxu0 %v205_v62  ;;  %v94_v19 = vrot.slane %v1011_v14, %v1186_v40  ;;  %v108_v20 = vrot.slane %v1014_v15, %v1186_v40  ;;  %v1006_v34 = vld [vmem:[%s1316_s1 + $0x170] sm:$0xff]  }
  0x16   :  { %902 = vmatprep.subr.bf16.mxu1 %v972_v22  ;;  %687 = vmatprep.mubr.bf16.mxu1 %v207_v4  ;;  %v1019_v22 = vld [vmem:[%s1315_s0 + $0x44] ss:$14 sps:$4 sm:$0x33]  }
  0x17   :  { %881 = vmatpush3.bf16.msra.mxu0 %v971_v21  ;;  %v1017_v21 = vld [vmem:[%s1315_s0 + $0x40] ss:$14 sps:$4 sm:$0xff]   ;;  %v172_v28 = vrot.slane %v1019_v22, %v1186_v40 }
  0x18   :  { %882 = vmatprep.subr.bf16.mxu0 %v974_v24  ;;  %v115_v24 = vrot.slane %v1016_v17, %v1186_v40  ;;  %v1007_v37 = vld [vmem:[%s1316_s1 + $0x130] sm:$0xff]  }
  0x19   :  { %903 = vmatpush3.bf16.msra.mxu1 %v973_v23  ;;  %v101_v23 = vrot.slane %v1013_v16, %v1186_v40 }
  0x1a   :  { %904 = vmatprep.subr.bf16.mxu1 %v976_v26  ;;  %v1022_v26 = vld [vmem:[%s1315_s0 + $0x60] ss:$14 sps:$4 sm:$0x33]  }
  0x1b   :  { %883 = vmatpush3.bf16.msra.mxu0 %v975_v25  ;;  %v1020_v25 = vld [vmem:[%s1315_s0 + $0x5c] ss:$14 sps:$4 sm:$0xff]   ;;  %v186_v32 = vrot.slane %v1022_v26, %v1186_v40  ;;  %v118_v33 = vcombine.low %v101_v23, %v115_v24 }
  0x1c   :  { %884 = vmatprep.subr.bf16.mxu0 %v978_v29  ;;  %v1005_v29 = vld [vmem:[%s1316_s1 + $0x128] sm:$0xff]  }
  0x1d   :  { %905 = vmatpush3.bf16.msra.mxu1 %v977_v27  ;;  %v165_v27 = vrot.slane %v1017_v21, %v1186_v40  ;;  %v189_v36 = vcombine.low %v172_v28, %v186_v32 }
  0x1e   :  { %906 = vmatprep.subr.bf16.mxu1 %v980_v31  ;;  %v179_v31 = vrot.slane %v1020_v25, %v1186_v40  ;;  %v1008_v40 = vld [vmem:[%s1316_s1 + $0x178] sm:$0xff]  }
  0x1f   :  { %885 = vmatpush3.bf16.msra.mxu0 %v979_v30  ;;  %v117_v30 = vcombine.high %v94_v19, %v108_v20  ;;  %v210_v39 = vpack.c.bf16 %v189_v36, %v118_v33 }
  0x20   :  { %914 = vmatprep.subr.bf16.mxu0 %v990_v42  ;;  %v188_v35 = vcombine.high %v165_v27, %v179_v31  ;;  %v187_v42 = vcombine.low %v165_v27, %v179_v31 }
  0x21   :  { %907 = vmatpush3.bf16.msra.mxu1 %v989_v41  ;;  %v116_v41 = vcombine.low %v94_v19, %v108_v20 }
  0x22   :  { %938 = vmatprep.subr.bf16.mxu1 %v1056_v53  ;;  %647 = vmatmul.mubr.bf16.vlgmr.msra.gmra.mrb[0].mxu0 %v204_v63  ;;  %v209_v38 = vpack.c.bf16 %v188_v35, %v117_v30 }
  0x23   :  { %915 = vmatpush3.bf16.msra.mxu0 %v995_v0  ;;  %v208_v44 = vpack.c.bf16 %v187_v42, %v116_v41 }
  0x24   :  { %916 = vmatprep.subr.bf16.mxu0 %v996_v3  ;;  %688 = vmatmul.mubr.bf16.vlgmr.msra.gmra.mrb[0].mxu1 %v206_v5 }
  0x25   :  { %940 = vmatprep.mubr.msk.bf16.mxu1 %vm1057_vm0, %v1056_v53  ;;  %939 = vmatpush3.bf16.msra.mxu1 %v1010_v12 }
  0x26   :  { %728 = vmatprep.mubr.bf16.mxu0 %v209_v38 }
  0x27   :  { %917 = vmatpush3.bf16.msra.mxu0 %v997_v6 }
  0x28   :  { %918 = vmatprep.subr.bf16.mxu0 %v998_v7 }
  0x2b   :  { %919 = vmatpush3.bf16.msra.mxu0 %v999_v8 }
  0x2c   :  { %920 = vmatprep.subr.bf16.mxu0 %v1000_v9  ;;  %941 = vmatmul.mubr.msk.bf16.vlgmr.msra.gmra.mrb[4].mxu1 %vm610_vm1, %v210_v39 }
  0x2f   :  { %921 = vmatpush3.bf16.msra.mxu0 %v1001_v10 }
  0x30   :  { %922 = vmatprep.subr.bf16.mxu0 %v1002_v11 }
  0x33   :  { %923 = vmatpush3.bf16.msra.mxu0 %v1003_v13 }
  0x34   :  { %924 = vmatprep.subr.bf16.mxu0 %v1004_v18 }
  0x37   :  { %925 = vmatpush3.bf16.msra.mxu0 %v1005_v29 }
  0x38   :  { %926 = vmatprep.subr.bf16.mxu0 %v1006_v34 }
  0x3b   :  { %927 = vmatpush3.bf16.msra.mxu0 %v1007_v37 }
  0x3c   :  { %928 = vmatprep.subr.bf16.mxu0 %v1008_v40 }
  0x3f   :  { %929 = vmatpush3.bf16.msra.mxu0 %v1009_v43 }
  0x42   :  { %729 = vmatmul.mubr.bf16.vlgmr.msra.gmra.mrb[4].mxu0 %v208_v44 }
  0xf5   :  { %v886_v45 = vpop.f32.mrb[0].mxu0 }
  0xf6   :  { %v887_v47 = vpop.f32.mrb[1].mxu0 }
  0xf7   :  { %v888_v48 = vadd.f32 %v887_v47, %v886_v45  ;;  %v889_v49 = vpop.f32.mrb[2].mxu0  ;;  %v908_v50 = vpop.f32.mrb[0].mxu1 }
  0xf8   :  { %v890_v51 = vpop.f32.mrb[3].mxu0  ;;  %v909_v54 = vpop.f32.mrb[1].mxu1 }
  0xf9   :  { %v649_v52 = vadd.f32 %v888_v48, %v819_v46  ;;  %v891_v53 = vadd.f32 %v890_v51, %v889_v49  ;;  %v910_v55 = vadd.f32 %v909_v54, %v908_v50  ;;  %v911_v56 = vpop.f32.mrb[2].mxu1 }
  0xfa   :  { %v912_v58 = vpop.f32.mrb[3].mxu1 }
  0xfb   :  { %v652_v57 = vadd.f32 %v891_v53, %v819_v46  ;;  %v690_v59 = vadd.f32 %v910_v55, %v649_v52  ;;  %v913_v60 = vadd.f32 %v912_v58, %v911_v56 }
  0xfd   :  { %v693_v61 = vadd.f32 %v913_v60, %v652_v57 }
  0xff   :  { %v771_v62 = vpop.f32.mrb[4].mxu1 }
 0x100   :  { %v942_v63 = vpop.f32.mrb[5].mxu1 }
 0x101   :  { %v774_v0 = vpop.f32.mrb[6].mxu1 }
 0x102   :  { %v943_v1 = vpop.f32.mrb[7].mxu1 }
 0x115   :  { %v930_v2 = vpop.f32.mrb[4].mxu0 }
 0x116   :  { %v931_v3 = vpop.f32.mrb[5].mxu0 }
 0x117   :  { %v932_v4 = vadd.f32 %v931_v3, %v930_v2  ;;  %v933_v5 = vpop.f32.mrb[6].mxu0 }
 0x118   :  { %v934_v6 = vpop.f32.mrb[7].mxu0 }
 0x119   :  { %v731_v7 = vadd.f32 %v932_v4, %v690_v59  ;;  %v935_v8 = vadd.f32 %v934_v6, %v933_v5 }
 0x11b   :  { %v772_v9 = vadd.f32 %v771_v62, %v731_v7  ;;  %v734_v10 = vadd.f32 %v935_v8, %v693_v61 }
 0x11d   :  { %v775_v11 = vadd.f32 %v774_v0, %v734_v10  ;;  %v779_v12 = vsel %vm778_vm2, %v772_v9, -inf }
 0x11e   :  { %780 = vmax.xlane.f32.xlu0 %v779_v12 }
 0x11f   :  { %v782_v13 = vsel %vm778_vm2, %v775_v11, -inf }
 0x122   :  { %783 = vmax.xlane.f32.xlu0 %v782_v13 }
 0x1ab   :  { %v781_v14 = vpop.xlane.xlu0 %780 }
 0x1ac   :  { %v785_v15 = vsub.f32 %v772_v9, %v781_v14 }
 0x1ae   :  { %v787_v16 = vmul.f32 1.442695, %v785_v15 }
 0x1af   :  { %v784_v17 = vpop.xlane.xlu0 %783 }
 0x1b0   :  { %1023 = vpow2.f32 %v787_v16  ;;  %v786_v18 = vsub.f32 %v775_v11, %v784_v17 }
 0x1b2   :  { %v789_v19 = vmul.f32 1.442695, %v786_v18 }
 0x1b4   :  { %1025 = vpow2.f32 %v789_v19 }
 0x1ba   :  { %v1024_v20 = vpop.eup %1023 }
 0x1bb   :  { %v791_v21 = vsel %vm778_vm2, %v1024_v20, 0.0 }
 0x1bc   :  { %792 = vadd.xlane.f32.xlu1 %v791_v21 }
 0x1be   :  { %v1026_v22 = vpop.eup %1025 }
 0x1bf   :  { %v794_v23 = vsel %vm778_vm2, %v1026_v22, 0.0 }
 0x1c0   :  { %795 = vadd.xlane.f32.xlu1 %v794_v23 }
 0x249   :  { %v793_v24 = vpop.xlane.xlu1 %792 }
 0x24a   :  { %1027 = vrcp.f32 %v793_v24 }
 0x24d   :  { %v796_v25 = vpop.xlane.xlu1 %795 }
 0x24e   :  { %1029 = vrcp.f32 %v796_v25 }
 0x254   :  { %v1028_v26 = vpop.eup %1027 }
 0x255   :  { %v798_v27 = vmul.f32 %v1028_v26, %v1024_v20 }
 0x257   :  { %801 = vst.msk [vmem:[#allocation2] sm:$0xff] %vm778_vm2, %v798_v27 }
 0x258   :  { %v1030_v28 = vpop.eup %1029 }
 0x259   :  { %v800_v29 = vmul.f32 %v1030_v28, %v1026_v22 }
 0x25b   :  { %802 = vst.msk [vmem:[#allocation2 + $0x8] sm:$0xff] %vm778_vm2, %v800_v29 }
 0x25c   :  { %807 = vsyncadd [#allocation3], 224  ;;  %s1058_s1 = smov [#allocation2]  }
 0x25d   :  { %s808_s2 = sshll.u32 %s1058_s1, 4  ;;  %s809_s2 = int_to_ptr.vmem [resolvable:$true] %s808_s2 }
 0x25e   :  { %s1031_s8 = scalar_lea.vmem %s809_s2, 32  ;;  %s1035_s9 = scalar_lea.vmem %s809_s2, 256 }
 0x25f   :  { %p1032_p0 = scmp.ne.s32.totalorder %s809_s2, %s1031_s8  ;;  %p1036_p1 = scmp.lt.s32.totalorder %s809_s2, %s809_s2 }
 0x260   :  { %p1037_p2 = scmp.lt.s32.totalorder %s1035_s9, %s1031_s8 }
 0x262   :  { %p1038_p3 = por %p1037_p2, %p1036_p1 }
 0x264   :  { %p1039_p4 = pnand %p1038_p3, %p1032_p0 }
 0x266   :  { %1042 = shalt.err (!%p1039_p4)
}
 0x267   :  { %s1043_s12 = scalar_lea.hbm %s1318_s3, 32 }
 0x268   :  { %p1044_p5 = scmp.ne.s32.totalorder %s1318_s3, %s1043_s12  ;;  %p1047_p6 = scmp.lt.u32.totalorder %s1043_s12, %s1318_s3 }
 0x26a   :  { %p1049_p7 = pnand %p1047_p6, %p1044_p5 }
 0x26c   :  { %1052 = shalt.err (!%p1049_p7)
}
 0x26d   :  { %s1059_s17 = smov 32   ;;  %s1060_s18 = smov 2  }
 0x26e   :  { %814 = dma.vmem_to_hbm [thread:$0]  %s809_s2, 32, %s1318_s3, [#allocation3], %s1059_s17, %s1059_s17, %s1060_s18  }
 0x26f   :  { %1053 = dma.done.wait [#allocation3], 256  }
 0x270   :  { %1054 = vsyncadd [#allocation3], 4294967040 }
 0x271   :  { %818 = vsyncpa [#allocation3], 1 }

</bundles_post_ra>
